<compile_context>
chip_gen: v7x
topology: tpu7x:2x2x1
jax: 0.10.0
libtpu: 0.0.40
codegen_flags: <defaults>
</compile_context>

<pallas_src>
import jax
import jax.numpy as jnp
from jax.experimental import pallas as pl
from jax.experimental.pallas import tpu as pltpu


def _round_up(x, m):
    return ((x + m - 1) // m) * m


def _make_ncf_kernel(d_mlp, factors, l1, l2, l3):
    """Builds the kernel with static slice offsets baked in."""
    o_b1 = 0
    o_b2 = l1
    o_b3 = l1 + l2
    o_wg = l1 + l2 + l3            # affine weights for the GMF half
    o_wm = o_wg + factors          # affine weights for the MLP half
    o_ba = o_wm + l3               # affine bias
    g_u = d_mlp                    # user_gmf lane offset in the cat block
    g_i = d_mlp + factors          # item_gmf lane offset in the cat block

    def kernel(cat_ref, w1_ref, w2_ref, w3_ref, slab_ref, out_ref):
        f32 = jnp.float32

        # Resident (1, 128) f32 slab with all biases / affine params.
        slab = slab_ref[...]
        b1 = slab[:, o_b1:o_b1 + l1]
        b2 = slab[:, o_b2:o_b2 + l2]
        b3 = slab[:, o_b3:o_b3 + l3]
        wa_gmf = slab[:, o_wg:o_wg + factors]
        wa_mlp = slab[:, o_wm:o_wm + l3]
        ba = slab[:, o_ba:o_ba + 1]

        # GMF branch: elementwise product on the VPU in f32 (v5e-safe).
        gmf = (cat_ref[:, g_u:g_u + factors].astype(f32)
               * cat_ref[:, g_i:g_i + factors].astype(f32))        # (tb, factors)

        # MLP branch: lane-aligned (tb, 64) prefix -> fused first MXU pass.
        v = jnp.dot(cat_ref[:, 0:d_mlp], w1_ref[...],
                    preferred_element_type=f32) + b1               # (tb, l1)
        v = jnp.maximum(v, 0.0)
        v = jnp.dot(v.astype(w2_ref.dtype), w2_ref[...],
                    preferred_element_type=f32) + b2               # (tb, l2)
        v = jnp.maximum(v, 0.0)
        v = jnp.dot(v.astype(w3_ref.dtype), w3_ref[...],
                    preferred_element_type=f32) + b3               # (tb, l3)
        v = jnp.maximum(v, 0.0)

        # Final affine on concat(gmf, v): VPU multiply + lane reduction
        # (no N=1 MXU pass).
        logits = (jnp.sum(gmf * wa_gmf, axis=-1, keepdims=True)
                  + jnp.sum(v * wa_mlp, axis=-1, keepdims=True)
                  + ba)                                            # (tb, 1)

        out_ref[...] = jax.nn.sigmoid(logits)

    return kernel


def ncf_forward(params, user, item, *, tile_b=4096, compute_dtype=jnp.bfloat16):
    """NCF forward.

    `compute_dtype` controls the streamed-embedding / MXU weight dtype;
    bf16 (default) halves HBM traffic on every TPU generation. Elementwise
    GMF / ReLU / reductions / sigmoid stay in f32.
    """
    B = user.shape[0]
    factors = params["emb_user_gmf"].shape[1]
    half = params["emb_user_mlp"].shape[1]
    d_mlp = 2 * half
    feat = d_mlp + 2 * factors
    dt = compute_dtype

    # ---- weights: PyTorch Linear is y = x @ W.T + b, W is (out, in). ----
    w1 = params["fc0_w"].T.astype(dt)                      # (64, 32)
    w2 = params["fc1_w"].T.astype(dt)                      # (32, 16)
    w3 = params["fc2_w"].T.astype(dt)                      # (16, 8)
    l1, l2, l3 = w1.shape[1], w2.shape[1], w3.shape[1]
    assert l1 + l2 + l3 + factors + l3 + 1 <= 128, "bias slab overflow"

    # ---- packed (1, 128) f32 bias/affine slab (one resident operand). ----
    wa = params["affine_w"].reshape(-1).astype(jnp.float32)        # (factors+l3,)
    slab = jnp.zeros((1, 128), jnp.float32)
    slab = slab.at[0, 0:l1].set(params["fc0_b"].astype(jnp.float32))
    slab = slab.at[0, l1:l1 + l2].set(params["fc1_b"].astype(jnp.float32))
    slab = slab.at[0, l1 + l2:l1 + l2 + l3].set(params["fc2_b"].astype(jnp.float32))
    o = l1 + l2 + l3
    slab = slab.at[0, o:o + factors].set(wa[:factors])
    slab = slab.at[0, o + factors:o + factors + l3].set(wa[factors:])
    slab = slab.at[0, o + factors + l3].set(params["affine_b"].astype(jnp.float32)[0])

    # ---- batch tiling: granule respects sublane packing; keep >= 2 grid
    # steps when the batch allows it (v7x megacore). ----
    granule = 16 if dt == jnp.bfloat16 else 8
    tile_b = max(granule, _round_up(int(tile_b), granule))
    tb = min(tile_b, max(granule, _round_up((B + 1) // 2, granule)))
    b_pad = _round_up(B, tb)
    if b_pad != B:
        pad = b_pad - B
        # Padded rows gather row 0 (tables assumed non-empty); they are
        # computed and sliced off below — each row is independent.
        user = jnp.concatenate([user, jnp.zeros((pad,), user.dtype)])
        item = jnp.concatenate([item, jnp.zeros((pad,), item.dtype)])

    # ---- glue: embedding gathers, fused concat + cast by XLA so the HBM
    # intermediate is a single (Bp, feat) array in `dt` (160 B/row bf16). ----
    cat_in = jnp.concatenate(
        [jnp.take(params["emb_user_mlp"], user, axis=0),
         jnp.take(params["emb_item_mlp"], item, axis=0),
         jnp.take(params["emb_user_gmf"], user, axis=0),
         jnp.take(params["emb_item_gmf"], item, axis=0)],
        axis=-1).astype(dt)                                       # (Bp, feat)
    # TODO(synk): fuse this gather into the kernel via scalar-prefetched index
    # vectors + manual make_async_copy row gathers to kill this HBM round trip.

    kernel = _make_ncf_kernel(d_mlp, factors, l1, l2, l3)

    def resident(shape):
        # Weight/bias blocks: loaded once, VMEM-resident across grid steps.
        return pl.BlockSpec(shape, lambda i: (0, 0))

    out = pl.pallas_call(
        kernel,
        out_shape=jax.ShapeDtypeStruct((b_pad, 1), jnp.float32),
        grid=(b_pad // tb,),
        in_specs=[
            pl.BlockSpec((tb, feat), lambda i: (i, 0)),   # streamed embeddings
            resident(w1.shape),
            resident(w2.shape),
            resident(w3.shape),
            resident(slab.shape),
        ],
        out_specs=pl.BlockSpec((tb, 1), lambda i: (i, 0)),
        compiler_params=pltpu.CompilerParams(
            dimension_semantics=("parallel",),
            vmem_limit_bytes=48 * 1024 * 1024),
    )(cat_in, w1, w2, w3, slab)

    return out[:B]


def init_params(key, num_users, num_items, factors=8, layers=(64, 32, 16, 8)):
    ks = jax.random.split(key, 16)
    std = 0.01
    p = {
        "emb_user_gmf": std * jax.random.normal(ks[0], (num_users, factors), jnp.float32),
        "emb_item_gmf": std * jax.random.normal(ks[1], (num_items, factors), jnp.float32),
        "emb_user_mlp": std * jax.random.normal(ks[2], (num_users, layers[0] // 2), jnp.float32),
        "emb_item_mlp": std * jax.random.normal(ks[3], (num_items, layers[0] // 2), jnp.float32),
    }
    for idx in range(1, len(layers)):
        p[f"fc{idx-1}_w"] = std * jax.random.normal(
            ks[3 + idx], (layers[idx], layers[idx - 1]), jnp.float32)   # (out, in)
        p[f"fc{idx-1}_b"] = jnp.zeros((layers[idx],), jnp.float32)
    p["affine_w"] = std * jax.random.normal(
        ks[10], (1, layers[-1] + factors), jnp.float32)                 # (1, 16)
    p["affine_b"] = jnp.zeros((1,), jnp.float32)
    return p


def ncf_reference(params, user, item):
    # Pure-JAX reference mirroring the PyTorch forward.
    user_gmf = params["emb_user_gmf"][user]
    item_gmf = params["emb_item_gmf"][item]
    gmf = user_gmf * item_gmf
    v = jnp.concatenate([params["emb_user_mlp"][user],
                         params["emb_item_mlp"][item]], axis=-1)
    for i in range(3):
        v = jnp.maximum(v @ params[f"fc{i}_w"].T + params[f"fc{i}_b"], 0.0)
    pred = jnp.concatenate([gmf, v], axis=-1)
    logits = pred @ params["affine_w"].T + params["affine_b"]
    return jax.nn.sigmoid(logits)


if __name__ == "__main__":
    num_users, num_items, batch = 100, 200, 8
    key = jax.random.PRNGKey(0)
    k_param, k_user, k_item = jax.random.split(key, 3)

    params = init_params(k_param, num_users, num_items)
    user = jax.random.randint(k_user, (batch,), 0, num_users, dtype=jnp.int32)
    item = jax.random.randint(k_item, (batch,), 0, num_items, dtype=jnp.int32)

    ref = ncf_reference(params, user, item)

    # f32 streaming path (matches PyTorch semantics closely).
    out_f32 = jax.block_until_ready(
        ncf_forward(params, user, item, compute_dtype=jnp.float32))
    assert out_f32.shape == (batch, 1)
    assert jnp.allclose(out_f32, ref, atol=1e-5, rtol=1e-4)

    # Default bf16 streaming path (halves HBM traffic on every generation).
    out_bf16 = jax.block_until_ready(ncf_forward(params, user, item))
    assert out_bf16.shape == (batch, 1)
    assert jnp.allclose(out_bf16, ref, atol=3e-3, rtol=3e-3)

    # Multi-tile grid path (non-divisible batch exercises padding + >=2 steps).
    big_batch = 300
    k_u2, k_i2 = jax.random.split(jax.random.PRNGKey(1))
    user2 = jax.random.randint(k_u2, (big_batch,), 0, num_users, dtype=jnp.int32)
    item2 = jax.random.randint(k_i2, (big_batch,), 0, num_items, dtype=jnp.int32)
    out2 = jax.block_until_ready(
        ncf_forward(params, user2, item2, tile_b=128, compute_dtype=jnp.float32))
    ref2 = ncf_reference(params, user2, item2)
    assert out2.shape == (big_batch, 1)
    assert jnp.allclose(out2, ref2, atol=1e-5, rtol=1e-4)

    print("KERNEL_OK")
</pallas_src>

<mosaic_0001>
module attributes {stable_mosaic.version = 11 : i64} {
  func.func @kernel(%arg0: i32, %arg1: memref<8x80xf32, #tpu.memory_space<vmem>>, %arg2: memref<64x32xf32, #tpu.memory_space<vmem>>, %arg3: memref<32x16xf32, #tpu.memory_space<vmem>>, %arg4: memref<16x8xf32, #tpu.memory_space<vmem>>, %arg5: memref<1x128xf32, #tpu.memory_space<vmem>>, %arg6: memref<8x1xf32, #tpu.memory_space<vmem>>) attributes {dimension_semantics = [#tpu.dimension_semantics<parallel>], iteration_bounds = array<i64: 1>, scalar_prefetch = 0 : i64, scratch_operands = 0 : i64, tpu.core_type = #tpu.core_type<tc>, window_params = [{transform_indices = @transform_0, window_bounds = array<i64: 8, 80>}, {pipeline_mode = #tpu.pipeline_mode<synchronous>, transform_indices = @transform_1, window_bounds = array<i64: 64, 32>}, {pipeline_mode = #tpu.pipeline_mode<synchronous>, transform_indices = @transform_2, window_bounds = array<i64: 32, 16>}, {pipeline_mode = #tpu.pipeline_mode<synchronous>, transform_indices = @transform_3, window_bounds = array<i64: 16, 8>}, {pipeline_mode = #tpu.pipeline_mode<synchronous>, transform_indices = @transform_4, window_bounds = array<i64: 1, 128>}, {transform_indices = @transform_5, window_bounds = array<i64: 8, 1>}]} {
    %c0 = arith.constant 0 : index
    %c0_0 = arith.constant 0 : index
    %0 = vector.load %arg5[%c0, %c0_0] : memref<1x128xf32, #tpu.memory_space<vmem>>, vector<1x128xf32>
    %1 = vector.extract_strided_slice %0 {offsets = [0, 0], sizes = [1, 32], strides = [1, 1]} : vector<1x128xf32> to vector<1x32xf32>
    %2 = vector.extract_strided_slice %0 {offsets = [0, 32], sizes = [1, 16], strides = [1, 1]} : vector<1x128xf32> to vector<1x16xf32>
    %3 = vector.extract_strided_slice %0 {offsets = [0, 48], sizes = [1, 8], strides = [1, 1]} : vector<1x128xf32> to vector<1x8xf32>
    %4 = vector.extract_strided_slice %0 {offsets = [0, 56], sizes = [1, 8], strides = [1, 1]} : vector<1x128xf32> to vector<1x8xf32>
    %5 = vector.extract_strided_slice %0 {offsets = [0, 64], sizes = [1, 8], strides = [1, 1]} : vector<1x128xf32> to vector<1x8xf32>
    %6 = vector.extract_strided_slice %0 {offsets = [0, 72], sizes = [1, 1], strides = [1, 1]} : vector<1x128xf32> to vector<1x1xf32>
    %c0_1 = arith.constant 0 : index
    %c64 = arith.constant 64 : index
    %7 = vector.load %arg1[%c0_1, %c64] : memref<8x80xf32, #tpu.memory_space<vmem>>, vector<8x8xf32>
    %c0_2 = arith.constant 0 : index
    %c72 = arith.constant 72 : index
    %8 = vector.load %arg1[%c0_2, %c72] : memref<8x80xf32, #tpu.memory_space<vmem>>, vector<8x8xf32>
    %9 = arith.mulf %7, %8 : vector<8x8xf32>
    %c0_3 = arith.constant 0 : index
    %c0_4 = arith.constant 0 : index
    %10 = vector.load %arg1[%c0_3, %c0_4] : memref<8x80xf32, #tpu.memory_space<vmem>>, vector<8x64xf32>
    %c0_5 = arith.constant 0 : index
    %c0_6 = arith.constant 0 : index
    %11 = vector.load %arg2[%c0_5, %c0_6] : memref<64x32xf32, #tpu.memory_space<vmem>>, vector<64x32xf32>
    %cst = arith.constant dense<0.000000e+00> : vector<8x32xf32>
    %12 = tpu.matmul %10, %11, %cst {dimension_numbers = #tpu.dot_dimension_numbers<[1], [0], [0], [1], [0, 0, 1, 1], [], []>} : vector<8x64xf32>, vector<64x32xf32>, vector<8x32xf32> -> vector<8x32xf32>
    %13 = vector.broadcast %1 : vector<1x32xf32> to vector<8x32xf32>
    %14 = arith.addf %12, %13 : vector<8x32xf32>
    %cst_7 = arith.constant 0.000000e+00 : f32
    %15 = vector.broadcast %cst_7 : f32 to vector<8x32xf32>
    %16 = arith.maximumf %14, %15 : vector<8x32xf32>
    %c0_8 = arith.constant 0 : index
    %c0_9 = arith.constant 0 : index
    %17 = vector.load %arg3[%c0_8, %c0_9] : memref<32x16xf32, #tpu.memory_space<vmem>>, vector<32x16xf32>
    %cst_10 = arith.constant dense<0.000000e+00> : vector<8x16xf32>
    %18 = tpu.matmul %16, %17, %cst_10 {dimension_numbers = #tpu.dot_dimension_numbers<[1], [0], [0], [1], [0, 0, 1, 1], [], []>} : vector<8x32xf32>, vector<32x16xf32>, vector<8x16xf32> -> vector<8x16xf32>
    %19 = vector.broadcast %2 : vector<1x16xf32> to vector<8x16xf32>
    %20 = arith.addf %18, %19 : vector<8x16xf32>
    %cst_11 = arith.constant 0.000000e+00 : f32
    %21 = vector.broadcast %cst_11 : f32 to vector<8x16xf32>
    %22 = arith.maximumf %20, %21 : vector<8x16xf32>
    %c0_12 = arith.constant 0 : index
    %c0_13 = arith.constant 0 : index
    %23 = vector.load %arg4[%c0_12, %c0_13] : memref<16x8xf32, #tpu.memory_space<vmem>>, vector<16x8xf32>
    %cst_14 = arith.constant dense<0.000000e+00> : vector<8x8xf32>
    %24 = tpu.matmul %22, %23, %cst_14 {dimension_numbers = #tpu.dot_dimension_numbers<[1], [0], [0], [1], [0, 0, 1, 1], [], []>} : vector<8x16xf32>, vector<16x8xf32>, vector<8x8xf32> -> vector<8x8xf32>
    %25 = vector.broadcast %3 : vector<1x8xf32> to vector<8x8xf32>
    %26 = arith.addf %24, %25 : vector<8x8xf32>
    %cst_15 = arith.constant 0.000000e+00 : f32
    %27 = vector.broadcast %cst_15 : f32 to vector<8x8xf32>
    %28 = arith.maximumf %26, %27 : vector<8x8xf32>
    %29 = vector.broadcast %4 : vector<1x8xf32> to vector<8x8xf32>
    %30 = arith.mulf %9, %29 : vector<8x8xf32>
    %cst_16 = arith.constant dense<0.000000e+00> : vector<8xf32>
    %31 = vector.multi_reduction <add>, %30, %cst_16 [1] : vector<8x8xf32> to vector<8xf32>
    %32 = vector.shape_cast %31 : vector<8xf32> to vector<8x1xf32>
    %33 = vector.broadcast %5 : vector<1x8xf32> to vector<8x8xf32>
    %34 = arith.mulf %28, %33 : vector<8x8xf32>
    %cst_17 = arith.constant dense<0.000000e+00> : vector<8xf32>
    %35 = vector.multi_reduction <add>, %34, %cst_17 [1] : vector<8x8xf32> to vector<8xf32>
    %36 = vector.shape_cast %35 : vector<8xf32> to vector<8x1xf32>
    %37 = arith.addf %32, %36 : vector<8x1xf32>
    %38 = vector.broadcast %6 : vector<1x1xf32> to vector<8x1xf32>
    %39 = arith.addf %37, %38 : vector<8x1xf32>
    %40 = arith.negf %39 : vector<8x1xf32>
    %41 = math.exp %40 : vector<8x1xf32>
    %cst_18 = arith.constant 1.000000e+00 : f32
    %42 = vector.broadcast %cst_18 : f32 to vector<8x1xf32>
    %43 = arith.addf %42, %41 : vector<8x1xf32>
    %44 = arith.divf %42, %43 : vector<8x1xf32>
    %c0_19 = arith.constant 0 : index
    %c0_20 = arith.constant 0 : index
    %45 = vector.load %arg6[%c0_19, %c0_20] : memref<8x1xf32, #tpu.memory_space<vmem>>, vector<8x1xf32>
    tpu.vector_store %arg6[%c0_19, %c0_20], %44 {strides = array<i32>} : memref<8x1xf32, #tpu.memory_space<vmem>>, vector<8x1xf32>,
    return
  }
  func.func @transform_0(%arg0: i32) -> (i32, i32) {
    %c0_i32 = arith.constant 0 : i32
    %c0_i32_0 = arith.constant 0 : i32
    return %arg0, %c0_i32 : i32, i32
  }
  func.func @transform_1(%arg0: i32) -> (i32, i32) {
    %c0_i32 = arith.constant 0 : i32
    %c0_i32_0 = arith.constant 0 : i32
    %c0_i32_1 = arith.constant 0 : i32
    return %c0_i32, %c0_i32_0 : i32, i32
  }
  func.func @transform_2(%arg0: i32) -> (i32, i32) {
    %c0_i32 = arith.constant 0 : i32
    %c0_i32_0 = arith.constant 0 : i32
    %c0_i32_1 = arith.constant 0 : i32
    return %c0_i32, %c0_i32_0 : i32, i32
  }
  func.func @transform_3(%arg0: i32) -> (i32, i32) {
    %c0_i32 = arith.constant 0 : i32
    %c0_i32_0 = arith.constant 0 : i32
    %c0_i32_1 = arith.constant 0 : i32
    return %c0_i32, %c0_i32_0 : i32, i32
  }
  func.func @transform_4(%arg0: i32) -> (i32, i32) {
    %c0_i32 = arith.constant 0 : i32
    %c0_i32_0 = arith.constant 0 : i32
    %c0_i32_1 = arith.constant 0 : i32
    return %c0_i32, %c0_i32_0 : i32, i32
  }
  func.func @transform_5(%arg0: i32) -> (i32, i32) {
    %c0_i32 = arith.constant 0 : i32
    %c0_i32_0 = arith.constant 0 : i32
    return %arg0, %c0_i32 : i32, i32
  }
}

</mosaic_0001>

<bundles_post_ra>
// kernel: tpu_custom_call.1
= control target key start
LH: loop header
LB: loop body
LE: loop exit
PB: predicated region body
PF: predicated region fallthrough
CT: control target
= control target key end

     0   :  { %v407_v0 = vmov 0.0|0.0   ;;  %vm408_vm0 = vmmov 0   ;;  %v409_v4 = vmov 0.0   ;;  %vm41_vm1 = vcmask 523264   ;;  %s410_s20 = smov 96   ;;  %s412_s21 = smov 120   ;;  %s500_s1 = inlined_call_operand.vmem [shape: f32[64,32], index: 1, kind: input, shape index: {}]   ;;  %s501_s2 = inlined_call_operand.vmem [shape: f32[32,16], index: 2, kind: input, shape index: {}]   ;;  %s502_s0 = inlined_call_operand.vmem [shape: f32[8,80], index: 0, kind: input, shape index: {}]   ;;  %s503_s4 = inlined_call_operand.vmem [shape: f32[1,128], index: 4, kind: input, shape index: {}]   ;;  %s504_s3 = inlined_call_operand.vmem [shape: f32[16,8], index: 3, kind: input, shape index: {}]   ;;  %s505_s5 = inlined_call_operand.vmem [shape: f32[8,1], index: 5, kind: output, shape index: {}]  }
   0x1   :  { %373 = vmatprep.subr.bf16.mxu0 %v407_v0  ;;  %v27_v1 = vld [vmem:[%s500_s1] sm:$0xff]  ;;  %v28_v2 = vld [vmem:[%s500_s1 + $0x8] sm:$0xff]  ;;  %v29_v3 = vld [vmem:[%s500_s1 + $0x10] sm:$0xff]  ;;  %352 = vmatprep.mubr.msk.f32.mxu0 %vm408_vm0, %v409_v4  ;;  %vm122_vm2 = vcmask 261120   ;;  %s413_s24 = smov 80   ;;  %s414_s25 = smov 64  }
   0x2   :  { %v374_v5 = vpack.c.bf16 %v28_v2, %v27_v1  ;;  %v30_v6 = vld [vmem:[%s500_s1 + $0x18] sm:$0xff]  ;;  %385 = vmatprep.subr.bf16.mxu1 %v407_v0  ;;  %363 = vmatprep.mubr.msk.f32.mxu1 %vm408_vm0, %v409_v4  ;;  %v115_v8 = vld [vmem:[%s501_s2] sm:$0xff]  ;;  %v116_v9 = vld [vmem:[%s501_s2 + $0x8] sm:$0xff]  ;;  %vm202_vm3 = vcmask 130048   ;;  %vm285_vm4 = vcmask 64512   ;;  %vm308_vm5 = vcmask 7168  }
   0x3   :  { %v377_v7 = vpack.c.bf16 %v30_v6, %v29_v3  ;;  %v31_v10 = vld [vmem:[%s500_s1 + $0x20] sm:$0xff]  ;;  %v32_v11 = vld [vmem:[%s500_s1 + $0x28] sm:$0xff]  ;;  %v386_v12 = vpack.c.bf16 %v116_v9, %v115_v8  ;;  %v33_v14 = vld [vmem:[%s500_s1 + $0x30] sm:$0xff] }
   0x4   :  { %375 = vmatpush3.bf16.msra.mxu0 %v374_v5  ;;  %v380_v13 = vpack.c.bf16 %v32_v11, %v31_v10  ;;  %v34_v15 = vld [vmem:[%s500_s1 + $0x38] sm:$0xff]  ;;  %v21_v17 = vld [vmem:[%s502_s0] sm:$0xff]  ;;  %v117_v18 = vld [vmem:[%s501_s2 + $0x10] sm:$0xff]  ;;  %s411_s0 = smov 8  }
   0x5   :  { %376 = vmatprep.subr.bf16.mxu0 %v407_v0  ;;  %387 = vmatpush3.bf16.msra.mxu1 %v386_v12  ;;  %v383_v16 = vpack.c.bf16 %v34_v15, %v33_v14  ;;  %v118_v19 = vld [vmem:[%s501_s2 + $0x18] sm:$0xff]  ;;  %v314_v21 = vld [vmem:[%s503_s4] ss:$0 sm:$0xff]  ;;  %v198_v27 = vld [vmem:[%s504_s3 + $0x8] sm:$0xff] }
   0x6   :  { %388 = vmatprep.subr.bf16.mxu1 %v407_v0  ;;  %v389_v20 = vpack.c.bf16 %v118_v19, %v117_v18  ;;  %119 = vrot.lane.b32.xlu0 %v314_v21, %s410_s20  ;;  %v197_v26 = vld [vmem:[%s504_s3] sm:$0xff]  ;;  %s415_s3 = smov 56  }
   0x7   :  { %277 = vrot.lane.b32.xlu1 %v314_v21, %s411_s0  ;;  %v392_v28 = vpack.c.bf16 %v198_v27, %v197_v26 }
   0x8   :  { %378 = vmatpush3.bf16.msra.mxu0 %v377_v7 }
   0x9   :  { %379 = vmatprep.subr.bf16.mxu0 %v407_v0  ;;  %390 = vmatpush3.bf16.msra.mxu1 %v389_v20 }
   0xa   :  { %391 = vmatprep.subr.bf16.mxu1 %v407_v0  ;;  %23 = vrot.lane.b32.xlu0 %v21_v17, %s412_s21 }
   0xb   :  { %199 = vrot.lane.b32.xlu1 %v314_v21, %s413_s24 }
   0xc   :  { %381 = vmatpush3.bf16.msra.mxu0 %v380_v13 }
   0xd   :  { %382 = vmatprep.subr.bf16.mxu0 %v407_v0 }
   0xe   :  { %289 = vrot.lane.b32.xlu0 %v314_v21, %s414_s25 }
  0x10   :  { %384 = vmatpush3.bf16.msra.mxu0 %v383_v16 }
  0x13   :  { %353 = vmatmul.mubr.msk.f32.vlgmr.msra.gmra.mrb[0].mxu0 %vm41_vm1, %v21_v17 }
  0x78   :  { %v120_v29 = vpop.permute.xlu0 %119 }
  0x79   :  { %v278_v31 = vpop.permute.xlu1 %277 }
  0x7c   :  { %v24_v30 = vpop.permute.xlu0 %23 }
  0x7d   :  { %v26_v32 = vmul.f32 %v24_v30, %v21_v17  ;;  %v200_v38 = vpop.permute.xlu1 %199 }
  0x7f   :  { %v280_v33 = vmul.f32 %v278_v31, %v26_v32 }
  0x80   :  { %v290_v44 = vpop.permute.xlu0 %289 }
  0x81   :  { %282 = vrot.lane.b32.xlu1 %v280_v33, %s414_s25 }
  0xe6   :  { %v110_v22 = vpop.f32.mrb[0].mxu0 }
  0xe7   :  { %v111_v23 = vadd.f32 %v314_v21, %v110_v22  ;;  %v354_v24 = vpop.f32.mrb[1].mxu0 }
  0xe9   :  { %v114_v25 = vmax.f32 %v111_v23, 0.0 }
  0xeb   :  { %364 = vmatmul.mubr.msk.f32.vlgmr.msra.gmra.mrb[0].mxu1 %vm122_vm2, %v114_v25 }
  0xec   :  { %370 = vmatprep.mubr.msk.f32.mxu1 %vm408_vm0, %v409_v4  ;;  %393 = vmatpush3.bf16.msra.mxu1 %v392_v28 }
  0xf3   :  { %v283_v39 = vpop.permute.xlu1 %282 }
  0xf4   :  { %v286_v40 = vsel %vm285_vm4, %v283_v39, 0.0 }
  0xf5   :  { %287 = vadd.xlane.f32.xlu0 %v286_v40 }
 0x182   :  { %v288_v48 = vpop.xlane.xlu0 %287 }
 0x1be   :  { %v192_v34 = vpop.f32.mrb[0].mxu1 }
 0x1bf   :  { %v193_v35 = vadd.f32 %v192_v34, %v120_v29  ;;  %v365_v36 = vpop.f32.mrb[1].mxu1 }
 0x1c1   :  { %v196_v37 = vmax.f32 %v193_v35, 0.0 }
 0x1c3   :  { %371 = vmatmul.mubr.msk.f32.vlgmr.msra.gmra.mrb[2].mxu1 %vm202_vm3, %v196_v37 }
 0x296   :  { %v272_v41 = vpop.f32.mrb[2].mxu1 }
 0x297   :  { %v273_v42 = vadd.f32 %v272_v41, %v200_v38  ;;  %v372_v43 = vpop.f32.mrb[3].mxu1 }
 0x299   :  { %v276_v45 = vmax.f32 %v273_v42, 0.0 }
 0x29b   :  { %v292_v46 = vmul.f32 %v290_v44, %v276_v45 }
 0x29d   :  { %v293_v47 = vsel %vm285_vm4, %v292_v46, 0.0 }
 0x29e   :  { %294 = vadd.xlane.f32.xlu1 %v293_v47 }
 0x32b   :  { %v295_v49 = vpop.xlane.xlu1 %294 }
 0x32c   :  { %v296_v50 = vadd.f32 %v295_v49, %v288_v48 }
 0x32e   :  { %v297_v51 = vadd.f32 %v314_v21, %v296_v50 }
 0x330   :  { %v318_v52 = vmul.f32 -1.442695, %v297_v51 }
 0x332   :  { %403 = vpow2.f32 %v318_v52 }
 0x33c   :  { %v404_v53 = vpop.eup %403 }
 0x33d   :  { %v301_v54 = vadd.f32 1.0, %v404_v53 }
 0x33f   :  { %405 = vrcp.f32 %v301_v54 }
 0x349   :  { %v406_v55 = vpop.eup %405 }
 0x34a   :  { %305 = vrot.lane.b32.xlu0 %v406_v55, %s415_s3 }
 0x3bc   :  { %v306_v56 = vpop.permute.xlu0 %305 }
 0x3bd   :  { %309 = vst.msk [vmem:[%s505_s5] sm:$0xff] %vm308_vm5, %v306_v56 }

</bundles_post_ra>
